<compile_context>
chip_gen: v5e
topology: v5e:2x2
jax: 0.10.0
libtpu: 0.0.40
codegen_flags: <defaults>
</compile_context>

<pallas_src>
import functools

import jax
import jax.numpy as jnp
from jax.experimental import pallas as pl
from jax.experimental.pallas import tpu as pltpu


def _fused_mlp_kernel(x_ref, w_ref, b_ref, o_ref, act_ref):
    """One grid step = one (layer l, output-feature tile j) pair.

    x_ref:   (M, K)         model input, f32 (constant block, DMA'd once)
    w_ref:   (1, 1, K, tn)  this layer's contiguous weight tile, bf16
    b_ref:   (L, 1, N)      full bias stack, f32 (resident constant block)
    o_ref:   (M, N)         output, f32 (constant block -> one HBM writeback)
    act_ref: (2, M, N)      f32 ping-pong activation scratch (persists)
    """
    l = pl.program_id(0)                 # layer index (outer, sequential)
    j = pl.program_id(1)                 # output-feature tile index (inner)
    n_layers = pl.num_programs(0)
    tn = w_ref.shape[-1]

    # First step of the whole grid: stage the model input into ping buffer 0.
    @pl.when((l == 0) & (j == 0))
    def _():
        act_ref[0] = x_ref[...]

    src = l % 2                          # read buffer for this layer
    dst = 1 - src                        # write buffer (input of next layer)
    col = pl.multiple_of(j * tn, tn)     # aligned lane offset of this tile

    # Full-K matmul on the MXU: bf16 x bf16 -> f32 accumulation.
    y = jnp.dot(act_ref[src].astype(jnp.bfloat16), w_ref[0, 0],
                preferred_element_type=jnp.float32)
    bias = b_ref[l, :, pl.ds(col, tn)]   # (1, tn) slice of the resident stack
    y = jnp.maximum(y + bias, 0.0)       # bias + ReLU

    # Feed the next layer via the ping-pong buffer.
    act_ref[dst, :, pl.ds(col, tn)] = y

    # Only the final layer populates the (resident) output block; it is written
    # back to HBM exactly once, when the grid finishes.
    @pl.when(l == n_layers - 1)
    def _():
        o_ref[:, pl.ds(col, tn)] = y.astype(o_ref.dtype)


@functools.partial(jax.jit, static_argnames=("weight_buffers",))
def fused_mlp(x, w_tiled, b_stack, *, weight_buffers=2):
    """Fused y = relu(...relu(x @ W0 + b0)... @ W9 + b9) in one pallas_call.

    x:        (M, K)              float32
    w_tiled:  (L, N//tn, K, tn)   bfloat16, tile-major, pre-transposed weights
    b_stack:  (L, 1, N)           float32
    Requires K == N (TestModel: in_features == hidden == out_features).
    """
    M, K = x.shape
    L, J, K2, tn = w_tiled.shape
    N = J * tn
    assert K == K2, "weight/activation K mismatch"
    assert K == N, "fused layer stack requires in == hidden == out features"
    assert b_stack.shape == (L, 1, N)
    assert N % 128 == 0 and tn % 128 == 0, "feature tiles must be lane-aligned"

    # Weight tile = the only large VMEM consumer; size the scoped limit so the
    # double/triple buffering never trips a per-chip default (16/32 MiB).
    w_bytes = weight_buffers * K * tn * w_tiled.dtype.itemsize
    other_bytes = (M * K * 4           # resident input block
                   + L * 8 * N * 4     # resident bias stack (sublane-padded)
                   + 2 * M * N * 4     # output block (double-buffered bound)
                   + 2 * M * N * 4)    # activation ping-pong scratch
    vmem_limit = int(min(max(2 * (w_bytes + other_bytes), 32 * 1024 * 1024),
                         64 * 1024 * 1024))

    w_block = (1, 1, K, tn)
    w_index = lambda l, j: (l, j, 0, 0)       # contiguous tile-major DMA
    if weight_buffers > 2:
        # v7x: a third weight buffer hides DMA jitter on the 3.2 TB/s stream.
        w_spec = pl.BlockSpec(w_block, w_index,
                              pipeline_mode=pl.Buffered(weight_buffers))
    else:
        w_spec = pl.BlockSpec(w_block, w_index)

    return pl.pallas_call(
        _fused_mlp_kernel,
        out_shape=jax.ShapeDtypeStruct((M, N), x.dtype),
        grid_spec=pltpu.PrefetchScalarGridSpec(
            num_scalar_prefetch=0,
            grid=(L, J),
            in_specs=[
                # Input activation: constant block, DMA'd once, stays resident.
                pl.BlockSpec((M, K), lambda l, j: (0, 0)),
                # Per-(layer, tile) weight block: the only large HBM stream.
                w_spec,
                # Full bias stack: resident constant block (no per-step DMA).
                pl.BlockSpec((L, 1, N), lambda l, j: (0, 0, 0)),
            ],
            # Constant-index output block: resident in VMEM, one writeback.
            out_specs=pl.BlockSpec((M, N), lambda l, j: (0, 0)),
            scratch_shapes=[
                pltpu.VMEM((2, M, N), jnp.float32),   # activation ping-pong
            ],
        ),
        compiler_params=pltpu.CompilerParams(
            # Layers are strictly sequential; N tiles share the activation
            # scratch, so neither axis may be split across cores.
            dimension_semantics=("arbitrary", "arbitrary"),
            vmem_limit_bytes=vmem_limit,
        ),
    )(x, w_tiled, b_stack)


def _choose_tn(n):
    """Largest lane-aligned tile <= 512 dividing n (512 is safe on all chips)."""
    if n <= 512:
        return n
    for tn in (512, 256, 128):
        if n % tn == 0:
            return tn
    return n


def pack_params(params, tn):
    """One-time host-side repack: stack, pre-transpose, cast bf16, tile-major.

    params: list of (W_t, b) with W_t shaped (fan_in, fan_out) (already x @ W_t).
    Returns w_tiled (L, N//tn, K, tn) bf16 and b_stack (L, 1, N) f32.
    """
    w_stack = jnp.stack([w for w, _ in params]).astype(jnp.bfloat16)   # (L, K, N)
    L, K, N = w_stack.shape
    assert N % tn == 0
    w_tiled = w_stack.reshape(L, K, N // tn, tn).transpose(0, 2, 1, 3)  # (L,J,K,tn)
    b_stack = jnp.stack([b.reshape(1, -1) for _, b in params]).astype(jnp.float32)
    return w_tiled, b_stack


def test_model_forward(x, params, *, tn=None, weight_buffers=2):
    """Full TestModel forward: 10 x (linear + relu), fused into one kernel."""
    n_out = params[-1][1].shape[0]
    if tn is None:
        tn = _choose_tn(n_out)
    w_tiled, b_stack = pack_params(params, tn)
    return fused_mlp(x, w_tiled, b_stack, weight_buffers=weight_buffers)


def init_linear_params(key, fan_in, fan_out):
    """Deterministic PyTorch-style (kaiming-uniform-ish) init. Returns (W_t, b)."""
    kw, kb = jax.random.split(key)
    bound = 1.0 / jnp.sqrt(float(fan_in))
    w_t = jax.random.uniform(kw, (fan_in, fan_out), jnp.float32, -bound, bound)
    b = jax.random.uniform(kb, (fan_out,), jnp.float32, -bound, bound)
    return w_t, b


if __name__ == "__main__":
    # Small shapes consistent with the module structure (scaled down from 5120).
    batch = 8
    in_features = 256
    hidden = 256
    out_features = 256

    key = jax.random.PRNGKey(0)
    keys = jax.random.split(key, 12)

    # Layer structure mirrors TestModel:
    #   linear1: in->hidden; linear2..5 (2 each): hidden->hidden; linear6: hidden->out
    dims = [(in_features, hidden)] + [(hidden, hidden)] * 8 + [(hidden, out_features)]
    params = [init_linear_params(keys[i], fi, fo) for i, (fi, fo) in enumerate(dims)]

    x = jax.random.normal(keys[10], (batch, in_features), jnp.float32)

    y = test_model_forward(x, params)
    y = jax.block_until_ready(y)
    assert y.shape == (batch, out_features)

    # Reference mirroring the kernel's precision: bf16 weights/activations into
    # the matmul, f32 accumulation, f32 bias + ReLU.
    ref = x
    for w_t, b in params:
        ref = jnp.maximum(
            jnp.dot(ref.astype(jnp.bfloat16), w_t.astype(jnp.bfloat16),
                    preferred_element_type=jnp.float32) + b, 0.0)
    assert jnp.allclose(y, ref, atol=2e-2, rtol=2e-2)

    print("KERNEL_OK")
</pallas_src>

<mosaic_0001>
module attributes {stable_mosaic.version = 11 : i64} {
  func.func @_fused_mlp_kernel(%arg0: i32, %arg1: i32, %arg2: memref<8x256xf32, #tpu.memory_space<vmem>>, %arg3: memref<1x1x256x256xbf16, #tpu.memory_space<vmem>>, %arg4: memref<10x1x256xf32, #tpu.memory_space<vmem>>, %arg5: memref<8x256xf32, #tpu.memory_space<vmem>>, %arg6: memref<2x8x256xf32, #tpu.memory_space<vmem>>) attributes {dimension_semantics = [#tpu.dimension_semantics<arbitrary>, #tpu.dimension_semantics<arbitrary>], iteration_bounds = array<i64: 10, 1>, scalar_prefetch = 0 : i64, scratch_operands = 1 : i64, tpu.core_type = #tpu.core_type<tc>, window_params = [{pipeline_mode = #tpu.pipeline_mode<synchronous>, transform_indices = @transform_0, window_bounds = array<i64: 8, 256>}, {transform_indices = @transform_1, window_bounds = array<i64: 1, 1, 256, 256>}, {pipeline_mode = #tpu.pipeline_mode<synchronous>, transform_indices = @transform_2, window_bounds = array<i64: 10, 1, 256>}, {pipeline_mode = #tpu.pipeline_mode<synchronous>, transform_indices = @transform_3, window_bounds = array<i64: 8, 256>}]} {
    %c0_i32 = arith.constant 0 : i32
    %0 = arith.cmpi eq, %arg0, %c0_i32 : i32
    %c0_i32_0 = arith.constant 0 : i32
    %1 = arith.cmpi eq, %arg1, %c0_i32_0 : i32
    %2 = arith.andi %0, %1 : i1
    %3 = arith.extui %2 : i1 to i32
    %c0_i32_1 = arith.constant 0 : i32
    %4 = arith.cmpi ne, %3, %c0_i32_1 : i32
    scf.if %4 {
      %c0_16 = arith.constant 0 : index
      %c0_17 = arith.constant 0 : index
      %41 = vector.load %arg2[%c0_16, %c0_17] : memref<8x256xf32, #tpu.memory_space<vmem>>, vector<8x256xf32>
      %c0_18 = arith.constant 0 : index
      %c0_19 = arith.constant 0 : index
      %c0_20 = arith.constant 0 : index
      %42 = vector.load %arg6[%c0_18, %c0_19, %c0_20] : memref<2x8x256xf32, #tpu.memory_space<vmem>>, vector<1x8x256xf32>
      %43 = vector.shape_cast %42 : vector<1x8x256xf32> to vector<8x256xf32>
      %44 = vector.shape_cast %41 : vector<8x256xf32> to vector<1x8x256xf32>
      tpu.vector_store %arg6[%c0_18, %c0_19, %c0_20], %44 {strides = array<i32>} : memref<2x8x256xf32, #tpu.memory_space<vmem>>, vector<1x8x256xf32>,
    } else {
    }
    %c2_i32 = arith.constant 2 : i32
    %c0_i32_2 = arith.constant 0 : i32
    %5 = arith.cmpi eq, %c2_i32, %c0_i32_2 : i32
    %c1_i32 = arith.constant 1 : i32
    %6 = arith.select %5, %c1_i32, %c2_i32 : i32
    %7 = arith.remsi %arg0, %6 : i32
    %c0_i32_3 = arith.constant 0 : i32
    %8 = arith.cmpi ne, %7, %c0_i32_3 : i32
    %c0_i32_4 = arith.constant 0 : i32
    %9 = arith.cmpi slt, %7, %c0_i32_4 : i32
    %c0_i32_5 = arith.constant 0 : i32
    %10 = arith.cmpi slt, %6, %c0_i32_5 : i32
    %11 = arith.xori %9, %10 : i1
    %12 = arith.andi %11, %8 : i1
    %13 = arith.addi %7, %6 : i32
    %14 = arith.select %12, %13, %7 : i32
    %c1_i32_6 = arith.constant 1 : i32
    %15 = arith.subi %c1_i32_6, %14 : i32
    %c256_i32 = arith.constant 256 : i32
    %16 = arith.muli %arg1, %c256_i32 : i32
    %17 = tpu.assume_multiple %16, 256 : i32
    %18 = arith.index_cast %14 : i32 to index
    %c0 = arith.constant 0 : index
    %c0_7 = arith.constant 0 : index
    %19 = vector.load %arg6[%18, %c0, %c0_7] : memref<2x8x256xf32, #tpu.memory_space<vmem>>, vector<1x8x256xf32>
    %20 = vector.shape_cast %19 : vector<1x8x256xf32> to vector<8x256xf32>
    %21 = arith.truncf %20 : vector<8x256xf32> to vector<8x256xbf16>
    %c0_8 = arith.constant 0 : index
    %c0_9 = arith.constant 0 : index
    %c0_10 = arith.constant 0 : index
    %c0_11 = arith.constant 0 : index
    %22 = vector.load %arg3[%c0_8, %c0_9, %c0_10, %c0_11] : memref<1x1x256x256xbf16, #tpu.memory_space<vmem>>, vector<1x1x256x256xbf16>
    %23 = vector.shape_cast %22 : vector<1x1x256x256xbf16> to vector<256x256xbf16>
    %cst = arith.constant dense<0.000000e+00> : vector<8x256xf32>
    %24 = tpu.matmul %21, %23, %cst {dimension_numbers = #tpu.dot_dimension_numbers<[1], [0], [0], [1], [0, 0, 1, 1], [], []>} : vector<8x256xbf16>, vector<256x256xbf16>, vector<8x256xf32> -> vector<8x256xf32>
    %25 = arith.index_cast %arg0 : i32 to index
    %c0_12 = arith.constant 0 : index
    %26 = arith.index_cast %17 : i32 to index
    %27 = vector.load %arg4[%25, %c0_12, %26] : memref<10x1x256xf32, #tpu.memory_space<vmem>>, vector<1x1x256xf32>
    %28 = vector.shape_cast %27 : vector<1x1x256xf32> to vector<1x256xf32>
    %29 = vector.broadcast %28 : vector<1x256xf32> to vector<8x256xf32>
    %30 = arith.addf %24, %29 : vector<8x256xf32>
    %cst_13 = arith.constant 0.000000e+00 : f32
    %31 = vector.broadcast %cst_13 : f32 to vector<8x256xf32>
    %32 = arith.maximumf %30, %31 : vector<8x256xf32>
    %33 = arith.index_cast %15 : i32 to index
    %c0_14 = arith.constant 0 : index
    %34 = arith.index_cast %17 : i32 to index
    %35 = vector.load %arg6[%33, %c0_14, %34] : memref<2x8x256xf32, #tpu.memory_space<vmem>>, vector<1x8x256xf32>
    %36 = vector.shape_cast %35 : vector<1x8x256xf32> to vector<8x256xf32>
    %37 = vector.shape_cast %32 : vector<8x256xf32> to vector<1x8x256xf32>
    tpu.vector_store %arg6[%33, %c0_14, %34], %37 {strides = array<i32>} : memref<2x8x256xf32, #tpu.memory_space<vmem>>, vector<1x8x256xf32>,
    %c9_i32 = arith.constant 9 : i32
    %38 = arith.cmpi eq, %arg0, %c9_i32 : i32
    %39 = arith.extui %38 : i1 to i32
    %c0_i32_15 = arith.constant 0 : i32
    %40 = arith.cmpi ne, %39, %c0_i32_15 : i32
    scf.if %40 {
      %c0_16 = arith.constant 0 : index
      %41 = arith.index_cast %17 : i32 to index
      %42 = vector.load %arg5[%c0_16, %41] : memref<8x256xf32, #tpu.memory_space<vmem>>, vector<8x256xf32>
      tpu.vector_store %arg5[%c0_16, %41], %32 {strides = array<i32>} : memref<8x256xf32, #tpu.memory_space<vmem>>, vector<8x256xf32>,
    } else {
    }
    return
  }
  func.func @transform_0(%arg0: i32, %arg1: i32) -> (i32, i32) {
    %c0_i32 = arith.constant 0 : i32
    %c0_i32_0 = arith.constant 0 : i32
    %c0_i32_1 = arith.constant 0 : i32
    return %c0_i32, %c0_i32_0 : i32, i32
  }
  func.func @transform_1(%arg0: i32, %arg1: i32) -> (i32, i32, i32, i32) {
    %c0_i32 = arith.constant 0 : i32
    %c0_i32_0 = arith.constant 0 : i32
    %c0_i32_1 = arith.constant 0 : i32
    return %arg0, %arg1, %c0_i32, %c0_i32_0 : i32, i32, i32, i32
  }
  func.func @transform_2(%arg0: i32, %arg1: i32) -> (i32, i32, i32) {
    %c0_i32 = arith.constant 0 : i32
    %c0_i32_0 = arith.constant 0 : i32
    %c0_i32_1 = arith.constant 0 : i32
    %c0_i32_2 = arith.constant 0 : i32
    return %c0_i32, %c0_i32_0, %c0_i32_1 : i32, i32, i32
  }
  func.func @transform_3(%arg0: i32, %arg1: i32) -> (i32, i32) {
    %c0_i32 = arith.constant 0 : i32
    %c0_i32_0 = arith.constant 0 : i32
    %c0_i32_1 = arith.constant 0 : i32
    return %c0_i32, %c0_i32_0 : i32, i32
  }
}

</mosaic_0001>

<bundles_post_ra>
// kernel: fused_mlp.1
= control target key start
LH: loop header
LB: loop body
LE: loop exit
PB: predicated region body
PF: predicated region fallthrough
CT: control target
= control target key end

     0   :  { %8 = vsyncpa [#allocation4], 0  ;;  %s1311_s0 = inlined_call_operand.hbm [shape: f32[8,256], index: 0, kind: input, shape index: {}]   ;;  %s1312_s1 = inlined_call_operand.hbm [shape: bf16[10,1,256,256], index: 1, kind: input, shape index: {}]   ;;  %s1313_s2 = inlined_call_operand.hbm [shape: f32[10,1,256], index: 2, kind: input, shape index: {}]   ;;  %s1314_s3 = inlined_call_operand.hbm [shape: f32[8,256], index: 3, kind: output, shape index: {}]  }
   0x1   :  { %9 = vsyncpa [#allocation7], 0 }
   0x2   :  { %11 = vsyncpa [#allocation7 + $0x1], 0 }
   0x3   :  { %12 = vsyncpa [#allocation5], 0  ;;  %s1117_s12 = smov 0   ;;  %s1119_s13 = smov 0  }
   0x4   :  { %s1121_s14 = smov 0   ;;  %s1123_s15 = smov 0  }
   0x5   :  { %s1125_s16 = smov 0   ;;  %s1127_s17 = smov 0  }
   0x6 LB: > { %s1146_s18 = sadd.s32 4294967295, %s1088_s17   ;;  %p73_p0 = scmp.ne.s32.totalorder %s1072_s13, %s1068_s12  ;;  %s1088_s17 = sphi %s1127_s17, %s18_s17   ;;  %s1084_s16 = sphi %s1125_s16, %s1322_s16   ;;  %s1080_s15 = sphi %s1123_s15, %s1321_s15   ;;  %s1076_s14 = sphi %s1121_s14, %s1320_s14   ;;  %s1072_s13 = sphi %s1119_s13, %s1319_s13   ;;  %s1068_s12 = sphi %s1117_s12, %s1318_s12  }
   0x7   : > { %p74_p1 = scmp.eq.s32.totalorder %s1146_s18, 0  ;;  %p632_p2 = scmp.ge.s32.totalorder %s1088_s17, 1 }
   0x8   : > { %p126_p3 = scmp.lt.s32.totalorder %s1088_s17, 11  ;;  %s149_s22 = sshll.u32 %s1313_s2, 4  ;;  %s150_s22 = int_to_ptr.hbm [resolvable:$true] %s149_s22 }
   0x9   : > { %p1154_p4 = por %p74_p1, %p73_p0  ;;  %s1090_s24 = smov [#allocation8]  }
   0xa   : > { %p1161_p5 = pnand %p632_p2, %p126_p3  ;;  %s151_s25 = sshll.u32 %s1090_s24, 4  ;;  %s152_s25 = int_to_ptr.vmem [resolvable:$true] %s151_s25 }
   0xb   : > { %s138_s28 = sshll.u32 %s1311_s0, 4  ;;  %s1091_s29 = smov 32   ;;  %s139_s28 = int_to_ptr.hbm [resolvable:$true] %s138_s28 }
   0xc   : > { %p835_p6 = pneg %p1161_p5  ;;  %s1092_s30 = smov 2  }
   0xd   : > { %s1093_s4 = smov [#allocation3]   ;;  %s30_s6 = sadd.s32 1, %s1084_s16 }
   0xe   : > { %p836_p7 = pnand %p835_p6, %p74_p1  ;;  %s140_s5 = sshll.u32 %s1093_s4, 4  ;;  %s141_s5 = int_to_ptr.vmem [resolvable:$true] %s140_s5 }
   0xf   : > { %s60_s7 = sadd.s32 1, %s1076_s14  ;;  %p32_p8 = scmp.ge.s32.totalorder %s30_s6, 10 }
  0x10   : > { %841 = dma.hbm_to_vmem [thread:$0]  (!%p836_p7), %s150_s22, 320, %s152_s25, [#allocation7], %s1091_s29, %s1091_s29, %s1092_s30  }
  0x11   : > { %838 = dma.hbm_to_vmem [thread:$0]  (!%p836_p7), %s139_s28, 256, %s141_s5, [#allocation4]  }
  0x12   : > { %p67_p9 = scmp.ne.s32.totalorder %s1076_s14, %s1072_s13  ;;  %p68_p10 = scmp.eq.s32.totalorder %s1088_s17, 0 }
  0x13   : > { %p848_p11 = scmp.lt.s32.totalorder %s1088_s17, 10  ;;  %s1324_s6 = smov (%p32_p8, %s30_s6), 0 }
  0x14   : > { %p1180_p12 = por %p68_p10, %p67_p9  ;;  %s165_s9 = sand.u32 1, %s1088_s17  }
  0x15   : > { %s55_s10 = ssub.s32 %s1084_s16, %s1324_s6  ;;  %s167_s11 = sand.u32 1, %s1076_s14  }
  0x16   : > { %p58_p13 = scmp.eq.s32.totalorder %s55_s10, 0  ;;  %s636_s12 = sshll.u32 %s167_s11, 8 }
  0x17   : > { %s785_s20 = sshll.u32 %s1084_s16, 8  ;;  %s169_s27 = scalar_lea.vmem [#allocation6], %s636_s12 }
  0x18   : > { %s1190_s21 = scalar_select %p58_p13, %s1076_s14, %s60_s7  }
  0x19   : > { %s176_s25 = scalar_lea.hbm %s1312_s1, %s785_s20  ;;  %s179_s28 = sshll.u32 %s169_s27, 4  ;;  %s180_s28 = int_to_ptr.vmem [resolvable:$true] %s179_s28 }
  0x1a   : > { %s177_s26 = sshll.u32 %s176_s25, 4  ;;  %p843_p0 = pnand %p848_p11, %p1180_p12  ;;  %s178_s26 = int_to_ptr.hbm [resolvable:$true] %s177_s26 }
  0x1b   : > { %s166_s29 = scalar_lea.sflag [#allocation7], %s165_s9  ;;  %s1094_s30 = smov 128  }
  0x1c   : > { %s1095_s4 = smov 8   ;;  %191 = sbr.rel (%p1161_p5) target bundleno = 231 (0xe7), region = 32 }
  0x1d   : > { %845 = dma.hbm_to_vmem [thread:$0]  (!%p843_p0), %s178_s26, 4096, %s180_s28, %s166_s29, %s1094_s30, %s1094_s30, %s1095_s4  }
  0x21   : > { %1051 = dma.done.wait (%p74_p1), [#allocation4], 256  }
  0x22   : > { %1053 = vsyncadd (%p74_p1), [#allocation4], 4294967040  ;;  %s198_s5 = sand.u32 1, %s1146_s18   ;;  %s200_s7 = sand.u32 1, %s1072_s13  }
  0x23   : > { %s641_s8 = sshll.u32 %s200_s7, 8  ;;  %s199_s10 = scalar_lea.sflag [#allocation7], %s198_s5 }
  0x24   : > { %s1207_s9 = scalar_lea.vmem [#allocation6], %s641_s8 }
  0x25   : > { %1055 = dma.done.wait (%p1154_p4), %s199_s10, 4096  }
  0x26   : > { %1057 = vsyncadd (%p1154_p4), %s199_s10, 4294963200 }
  0x27   : > { %1059 = dma.done.wait (%p74_p1), [#allocation7], 320  }
  0x28   : > { %1061 = vsyncadd (%p74_p1), [#allocation7], 4294966976  ;;  %p226_p2 = scmp.eq.s32.totalorder %s1080_s15, 0 }
  0x29   : > { %v232_v0 = vld [vmem:[#allocation3] sm:$0xff] (%p226_p2)  ;;  %v233_v1 = vld [vmem:[#allocation3 + $0x8] sm:$0xff] (%p226_p2) }
  0x2a   : > { %231 = sbr.rel (!%p226_p2) target bundleno = 47 (0x2f), region = 48  ;;  %234 = vst [vmem:[#allocation2] sm:$0xff] (%p226_p2), %v232_v0 }
  0x2b   : > { %235 = vst [vmem:[#allocation2 + $0x8] sm:$0xff] (%p226_p2), %v233_v1 }
  0x2f PF: > { %v708_v2 = vld [vmem:[%s1207_s9 + $0x70] sm:$0xf]  ;;  %v803_v3 = vld [vmem:[%s1207_s9 + $0x74] sm:$0xf0]  ;;  %v802_v7 = vld [vmem:[%s1207_s9 + $0x74] sm:$0xf] }
  0x30   : > { %v772_v4 = vld [vmem:[%s1207_s9 + $0xf0] sm:$0xf]  ;;  %v709_v5 = vor.u32 %v803_v3, %v708_v2  ;;  %v819_v6 = vld [vmem:[%s1207_s9 + $0xf4] sm:$0xf0]  ;;  %v710_v8 = vld [vmem:[%s1207_s9 + $0x78] sm:$0xf0] }
  0x31   : > { %v773_v9 = vor.u32 %v819_v6, %v772_v4  ;;  %v713_v10 = vor.u32 %v802_v7, %v710_v8  ;;  %v818_v11 = vld [vmem:[%s1207_s9 + $0xf4] sm:$0xf]  ;;  %v774_v12 = vld [vmem:[%s1207_s9 + $0xf8] sm:$0xf0]  ;;  %v700_v13 = vld [vmem:[%s1207_s9 + $0x60] sm:$0xf] }
  0x32   : > { %460 = vmatpush.bf16.msra.mxu0 %v709_v5  ;;  %v777_v14 = vor.u32 %v818_v11, %v774_v12  ;;  %v801_v15 = vld [vmem:[%s1207_s9 + $0x64] sm:$0xf0]  ;;  %v764_v16 = vld [vmem:[%s1207_s9 + $0xe0] sm:$0xf]  ;;  %v800_v20 = vld [vmem:[%s1207_s9 + $0x64] sm:$0xf] }
  0x33   : > { %v817_v17 = vld [vmem:[%s1207_s9 + $0xe4] sm:$0xf0]  ;;  %473 = vmatpush.bf16.msra.mxu1 %v773_v9  ;;  %486 = vmatpush.bf16.msra.mxu2 %v713_v10  ;;  %v701_v18 = vor.u32 %v801_v15, %v700_v13  ;;  %v702_v21 = vld [vmem:[%s1207_s9 + $0x68] sm:$0xf0]  ;;  %v816_v22 = vld [vmem:[%s1207_s9 + $0xe4] sm:$0xf] }
  0x34   : > { %v765_v19 = vor.u32 %v817_v17, %v764_v16  ;;  %499 = vmatpush.bf16.msra.mxu3 %v777_v14  ;;  %v705_v23 = vor.u32 %v800_v20, %v702_v21  ;;  %v766_v24 = vld [vmem:[%s1207_s9 + $0xe8] sm:$0xf0]  ;;  %v692_v25 = vld [vmem:[%s1207_s9 + $0x50] sm:$0xf]  ;;  %v799_v26 = vld [vmem:[%s1207_s9 + $0x54] sm:$0xf0] }
  0x35   : > { %v769_v27 = vor.u32 %v816_v22, %v766_v24  ;;  %v756_v28 = vld [vmem:[%s1207_s9 + $0xd0] sm:$0xf]  ;;  %v815_v29 = vld [vmem:[%s1207_s9 + $0xd4] sm:$0xf0]  ;;  %v798_v30 = vld [vmem:[%s1207_s9 + $0x54] sm:$0xf]  ;;  %v693_v31 = vor.u32 %v799_v26, %v692_v25 }
  0x36   : > { %461 = vmatpush.bf16.msra.mxu0 %v701_v18  ;;  %v694_v32 = vld [vmem:[%s1207_s9 + $0x58] sm:$0xf0]  ;;  %v814_v33 = vld [vmem:[%s1207_s9 + $0xd4] sm:$0xf]  ;;  %v757_v35 = vor.u32 %v815_v29, %v756_v28  ;;  %v684_v37 = vld [vmem:[%s1207_s9 + $0x40] sm:$0xf] }
  0x37   : > { %v758_v34 = vld [vmem:[%s1207_s9 + $0xd8] sm:$0xf0]  ;;  %474 = vmatpush.bf16.msra.mxu1 %v765_v19  ;;  %487 = vmatpush.bf16.msra.mxu2 %v705_v23  ;;  %v697_v36 = vor.u32 %v798_v30, %v694_v32  ;;  %v797_v38 = vld [vmem:[%s1207_s9 + $0x44] sm:$0xf0]  ;;  %v748_v39 = vld [vmem:[%s1207_s9 + $0xc0] sm:$0xf] }
  0x38   : > { %500 = vmatpush.bf16.msra.mxu3 %v769_v27  ;;  %v761_v40 = vor.u32 %v814_v33, %v758_v34  ;;  %v813_v41 = vld [vmem:[%s1207_s9 + $0xc4] sm:$0xf0]  ;;  %v796_v42 = vld [vmem:[%s1207_s9 + $0x44] sm:$0xf]  ;;  %v686_v43 = vld [vmem:[%s1207_s9 + $0x48] sm:$0xf0]  ;;  %v685_v46 = vor.u32 %v797_v38, %v684_v37 }
  0x39   : > { %v812_v44 = vld [vmem:[%s1207_s9 + $0xc4] sm:$0xf]  ;;  %v750_v45 = vld [vmem:[%s1207_s9 + $0xc8] sm:$0xf0]  ;;  %v749_v47 = vor.u32 %v813_v41, %v748_v39  ;;  %v689_v48 = vor.u32 %v796_v42, %v686_v43  ;;  %v676_v49 = vld [vmem:[%s1207_s9 + $0x30] sm:$0xf] }
  0x3a   : > { %462 = vmatpush.bf16.msra.mxu0 %v693_v31  ;;  %v795_v50 = vld [vmem:[%s1207_s9 + $0x34] sm:$0xf0]  ;;  %v740_v51 = vld [vmem:[%s1207_s9 + $0xb0] sm:$0xf]  ;;  %v753_v52 = vor.u32 %v812_v44, %v750_v45  ;;  %v794_v54 = vld [vmem:[%s1207_s9 + $0x34] sm:$0xf] }
  0x3b   : > { %475 = vmatpush.bf16.msra.mxu1 %v757_v35  ;;  %488 = vmatpush.bf16.msra.mxu2 %v697_v36  ;;  %v811_v53 = vld [vmem:[%s1207_s9 + $0xb4] sm:$0xf0]  ;;  %v678_v55 = vld [vmem:[%s1207_s9 + $0x38] sm:$0xf0]  ;;  %v810_v56 = vld [vmem:[%s1207_s9 + $0xb4] sm:$0xf]  ;;  %v677_v58 = vor.u32 %v795_v50, %v676_v49 }
  0x3c   : > { %501 = vmatpush.bf16.msra.mxu3 %v761_v40  ;;  %v742_v57 = vld [vmem:[%s1207_s9 + $0xb8] sm:$0xf0]  ;;  %v741_v59 = vor.u32 %v811_v53, %v740_v51  ;;  %v681_v60 = vor.u32 %v794_v54, %v678_v55  ;;  %v668_v61 = vld [vmem:[%s1207_s9 + $0x20] sm:$0xf]  ;;  %v793_v62 = vld [vmem:[%s1207_s9 + $0x24] sm:$0xf0] }
  0x3d   : > { %v732_v63 = vld [vmem:[%s1207_s9 + $0xa0] sm:$0xf]  ;;  %v745_v0 = vor.u32 %v810_v56, %v742_v57  ;;  %v809_v1 = vld [vmem:[%s1207_s9 + $0xa4] sm:$0xf0]  ;;  %v792_v2 = vld [vmem:[%s1207_s9 + $0x24] sm:$0xf]  ;;  %v669_v6 = vor.u32 %v793_v62, %v668_v61 }
  0x3e   : > { %463 = vmatpush.bf16.msra.mxu0 %v685_v46  ;;  %v670_v3 = vld [vmem:[%s1207_s9 + $0x28] sm:$0xf0]  ;;  %v808_v4 = vld [vmem:[%s1207_s9 + $0xa4] sm:$0xf]  ;;  %v660_v7 = vld [vmem:[%s1207_s9 + $0x10] sm:$0xf]  ;;  %v733_v8 = vor.u32 %v809_v1, %v732_v63 }
  0x3f   : > { %476 = vmatpush.bf16.msra.mxu1 %v749_v47  ;;  %489 = vmatpush.bf16.msra.mxu2 %v689_v48  ;;  %v734_v5 = vld [vmem:[%s1207_s9 + $0xa8] sm:$0xf0]  ;;  %v673_v9 = vor.u32 %v792_v2, %v670_v3  ;;  %v791_v10 = vld [vmem:[%s1207_s9 + $0x14] sm:$0xf0]  ;;  %v724_v11 = vld [vmem:[%s1207_s9 + $0x90] sm:$0xf] }
  0x40   : > { %502 = vmatpush.bf16.msra.mxu3 %v753_v52  ;;  %v807_v12 = vld [vmem:[%s1207_s9 + $0x94] sm:$0xf0]  ;;  %v737_v13 = vor.u32 %v808_v4, %v734_v5  ;;  %v790_v14 = vld [vmem:[%s1207_s9 + $0x14] sm:$0xf]  ;;  %v662_v15 = vld [vmem:[%s1207_s9 + $0x18] sm:$0xf0]  ;;  %v661_v18 = vor.u32 %v791_v10, %v660_v7 }
  0x41   : > { %p236_p1 = scmp.lt.s32.totalorder %s1080_s15, 0  ;;  %s237_s19 = ssub.s32 0, %s1080_s15  ;;  %v806_v16 = vld [vmem:[%s1207_s9 + $0x94] sm:$0xf]  ;;  %v726_v17 = vld [vmem:[%s1207_s9 + $0x98] sm:$0xf0]  ;;  %v725_v20 = vor.u32 %v807_v12, %v724_v11  ;;  %v665_v21 = vor.u32 %v790_v14, %v662_v15 }
  0x42   : > { %464 = vmatpush.bf16.msra.mxu0 %v677_v58  ;;  %s644_s23 = smin.u32 %s1080_s15, %s237_s19  ;;  %v652_v19 = vld [vmem:[%s1207_s9] sm:$0xf]  ;;  %v789_v22 = vld [vmem:[%s1207_s9 + $0x4] sm:$0xf0]  ;;  %v729_v24 = vor.u32 %v806_v16, %v726_v17  ;;  %v788_v26 = vld [vmem:[%s1207_s9 + $0x4] sm:$0xf] }
  0x43   : > { %477 = vmatpush.bf16.msra.mxu1 %v741_v59  ;;  %490 = vmatpush.bf16.msra.mxu2 %v681_v60  ;;  %s239_s11 = sand.u32 1, %s644_s23   ;;  %v716_v23 = vld [vmem:[%s1207_s9 + $0x80] sm:$0xf]  ;;  %v805_v25 = vld [vmem:[%s1207_s9 + $0x84] sm:$0xf0]  ;;  %v653_v30 = vor.u32 %v789_v22, %v652_v19  ;;  %s649_s25 = sshll.u32 %s1080_s15, 1 }
  0x44   : > { %503 = vmatpush.bf16.msra.mxu3 %v745_v0  ;;  %s240_s12 = ssub.s32 0, %s239_s11  ;;  %v654_v27 = vld [vmem:[%s1207_s9 + $0x8] sm:$0xf0]  ;;  %v804_v28 = vld [vmem:[%s1207_s9 + $0x84] sm:$0xf]  ;;  %v717_v31 = vor.u32 %v805_v25, %v716_v23  ;;  %s293_s26 = scalar_lea.vmem [#allocation8], %s649_s25 }
  0x45   : > { %s1326_s12 = smov (!%p236_p1, %s240_s12), %s239_s11  ;;  %v718_v29 = vld [vmem:[%s1207_s9 + $0x88] sm:$0xf0]  ;;  %v657_v32 = vor.u32 %v788_v26, %v654_v27  ;;  %v294_v38 = vld [vmem:[%s293_s26] sm:$0x3]  ;;  %p780_p4 = scmp.ne.s32.totalorder %s1080_s15, 9 }
  0x46   : > { %465 = vmatpush.bf16.msra.mxu0 %v669_v6  ;;  %p646_p3 = scmp.lt.s32.totalorder %s1326_s12, 0  ;;  %s246_s20 = sadd.s32 2, %s1326_s12  ;;  %v721_v33 = vor.u32 %v804_v28, %v718_v29  ;;  %v296_v39 = vperm.slane %v294_v38, 0  ;;  %v297_v44 = vperm.slane %v294_v38, 1 }
  0x47   : > { %478 = vmatpush.bf16.msra.mxu1 %v733_v8  ;;  %491 = vmatpush.bf16.msra.mxu2 %v673_v9 }
  0x48   : > { %504 = vmatpush.bf16.msra.mxu3 %v737_v13  ;;  %s1328_s20 = smov (!%p646_p3, %s246_s20), %s1326_s12 }
  0x49   : > { %s787_s22 = sshll.u32 %s1328_s20, 4  ;;  %s248_s27 = ssub.s32 1, %s1328_s20 }
  0x4a   : > { %466 = vmatpush.bf16.msra.mxu0 %v661_v18  ;;  %s252_s24 = scalar_lea.vmem [#allocation2], %s787_s22  ;;  %s820_s28 = sshll.u32 %s248_s27, 4 }
  0x4b   : > { %479 = vmatpush.bf16.msra.mxu1 %v725_v20  ;;  %492 = vmatpush.bf16.msra.mxu2 %v665_v21  ;;  %v253_v34 = vld [vmem:[%s252_s24] sm:$0xff]  ;;  %v254_v35 = vld [vmem:[%s252_s24 + $0x8] sm:$0xff]  ;;  %s517_s29 = scalar_lea.vmem [#allocation2], %s820_s28 }
  0x4c   : > { %505 = vmatpush.bf16.msra.mxu3 %v729_v24  ;;  %v255_v36 = vpack.c.bf16 %v253_v34, %v253_v34  ;;  %v256_v37 = vpack.c.bf16 %v254_v35, %v254_v35 }
  0x4e   : > { %467 = vmatpush.bf16.msra.mxu0 %v653_v30 }
  0x4f   : > { %480 = vmatpush.bf16.msra.mxu1 %v717_v31  ;;  %493 = vmatpush.bf16.msra.mxu2 %v657_v32 }
  0x50   : > { %506 = vmatpush.bf16.msra.mxu3 %v721_v33 }
  0x51   : > { %468 = vmatmul.bf16.vlgmr.msra.gmra.mxu0 %v255_v36 }
  0x52   : > { %481 = vmatmul.bf16.vlgmr.msra.gmra.mxu1 %v256_v37  ;;  %494 = vmatmul.bf16.vlgmr.msra.gmra.mxu2 %v255_v36 }
  0x53   : > { %507 = vmatmul.bf16.vlgmr.msra.gmra.mxu3 %v256_v37 }
  0xce   : > { %v469_v40 = vpop.f32.mrf.mxu0 }
  0xcf   : > { %v482_v41 = vpop.f32.mrf.mxu1  ;;  %v470_v42 = vadd.f32 %v469_v40, %v296_v39 }
  0xd1   : > { %v483_v43 = vadd.f32 %v482_v41, %v470_v42 }
  0xd3   : > { %v512_v45 = vmax.f32 %v483_v43, 0.0 }
  0xd5   : > { %518 = vst [vmem:[%s517_s29] sm:$0xff] %v512_v45  ;;  %v495_v46 = vpop.f32.mrf.mxu2 }
  0xd6   : > { %v508_v47 = vpop.f32.mrf.mxu3  ;;  %v496_v48 = vadd.f32 %v495_v46, %v297_v44  ;;  %v471_v49 = vpop.f32.mrf.mxu0 }
  0xd7   : > { %v484_v50 = vpop.f32.mrf.mxu1 }
  0xd8   : > { %v509_v51 = vadd.f32 %v508_v47, %v496_v48 }
  0xda   : > { %v513_v52 = vmax.f32 %v509_v51, 0.0  ;;  %523 = sbr.rel (%p780_p4) target bundleno = 225 (0xe1), region = 52 }
  0xdc   : > { %519 = vst [vmem:[%s517_s29 + $0x8] sm:$0xff] %v513_v52 }
  0xdd   : > { %v497_v53 = vpop.f32.mrf.mxu2 }
  0xde   : > { %v510_v54 = vpop.f32.mrf.mxu3 }
  0xdf   : > { %526 = vst [vmem:[#allocation9] sm:$0xff] %v512_v45 }
  0xe0   : > { %527 = vst [vmem:[#allocation9 + $0x8] sm:$0xff] %v513_v52 }
  0xe1 PF: > { %p851_p5 = scmp.eq.s32.totalorder %s1146_s18, 9  ;;  %s536_s5 = sshll.u32 %s1314_s3, 4  ;;  %s537_s5 = int_to_ptr.hbm [resolvable:$true] %s536_s5 }
  0xe2   : > { %s1096_s7 = smov [#allocation9]  }
  0xe3   : > { %s534_s8 = sshll.u32 %s1096_s7, 4  ;;  %s535_s8 = int_to_ptr.vmem [resolvable:$true] %s534_s8 }
  0xe4   : > { %832 = dma.vmem_to_hbm [thread:$0]  (%p851_p5), %s535_s8, 256, %s537_s5, [#allocation5]  }
  0xe5   : > { %1063 = dma.done.wait (%p851_p5), [#allocation5], 256  }
  0xe6   : > { %1065 = vsyncadd (%p851_p5), [#allocation5], 4294967040 }
  0xe7 PF: > { %s18_s17 = sadd.s32 1, %s1088_s17   ;;  %s1318_s12 = smov %s1072_s13 }
  0xe8   : > { %p15_p6 = scmp.ge.s32.totalorder %s18_s17, 12   ;;  %s1319_s13 = smov %s1076_s14 }
  0xe9   : > { %s1320_s14 = smov %s1190_s21  ;;  %s1321_s15 = smov %s1084_s16 }
  0xea   : > { %s1322_s16 = smov %s1324_s6  ;;  %17 = sbr.rel (!%p15_p6) target bundleno = 6 (0x6), region = 90 }
  0xef   :  { %550 = vsyncpa [#allocation4], 1 }
  0xf0   :  { %552 = vsyncpa [#allocation4 + $0x1], 1 }
  0xf1   :  { %553 = vsyncpa [#allocation7], 1 }
  0xf2   :  { %555 = vsyncpa [#allocation7 + $0x1], 1 }
  0xf3   :  { %556 = vsyncpa [#allocation5], 1 }
  0xf4   :  { %558 = vsyncpa [#allocation5 + $0x1], 1 }

</bundles_post_ra>
